<compile_context>
chip_gen: v7x
topology: tpu7x:2x2x1
jax: 0.10.0
libtpu: 0.0.40
codegen_flags: <defaults>
</compile_context>

<pallas_src>
import functools

import jax
import jax.numpy as jnp
from jax import lax
from jax.experimental import pallas as pl
from jax.experimental.pallas import tpu as pltpu

BN_EPS = 1e-5
_LANE = 128
_SUBLANE = 8
_VMEM_LIMIT_BYTES = 48 * 1024 * 1024   # headroom under v7x's 64 MiB physical VMEM


def _round_up(x, m):
    return (x + m - 1) // m * m


# ---------------- Stage A: h = x @ W1 (bf16 MXU) + BN1 sum / sumsq accumulation -------------
def _fc1_stats_kernel(x_ref, w1_ref, h_ref, sum_ref, ssq_ref):
    i = pl.program_id(0)
    h = jnp.dot(x_ref[...], w1_ref[...], preferred_element_type=jnp.float32)
    h_ref[...] = h

    @pl.when(i == 0)
    def _init():
        sum_ref[...] = jnp.zeros_like(sum_ref)
        ssq_ref[...] = jnp.zeros_like(ssq_ref)

    sum_ref[...] += jnp.sum(h, axis=0, keepdims=True)
    ssq_ref[...] += jnp.sum(h * h, axis=0, keepdims=True)


# -------- Stage B: BN1 (folded scale/shift) + ReLU + z = a @ W2 (bf16) + BN2 sums -----------
def _bn_relu_fc2_stats_kernel(h_ref, s1_ref, t1_ref, w2_ref,
                              z_ref, sum_ref, ssq_ref, *, tile_rows, n_valid):
    i = pl.program_id(0)
    a = h_ref[...] * s1_ref[...] + t1_ref[...]      # BN1 folded into one mul + one add (f32)
    a = jnp.maximum(a, 0.0)                         # ReLU (f32)
    if n_valid is not None:                         # zero padded batch rows so they do not
        rows = i * tile_rows + lax.broadcasted_iota(jnp.int32, a.shape, 0)
        a = jnp.where(rows < n_valid, a, 0.0)       # pollute the BN2 statistics
    z = jnp.dot(a.astype(jnp.bfloat16), w2_ref[...],
                preferred_element_type=jnp.float32)
    z_ref[...] = z

    @pl.when(i == 0)
    def _init():
        sum_ref[...] = jnp.zeros_like(sum_ref)
        ssq_ref[...] = jnp.zeros_like(ssq_ref)

    sum_ref[...] += jnp.sum(z, axis=0, keepdims=True)
    ssq_ref[...] += jnp.sum(z * z, axis=0, keepdims=True)


# ---------------- Stage C: out = z * s2 + t2 (pure elementwise, batch-parallel) -------------
def _bn_affine_kernel(z_ref, s2_ref, t2_ref, o_ref):
    o_ref[...] = (z_ref[...] * s2_ref[...] + t2_ref[...]).astype(o_ref.dtype)


def _pad2(a, rows, cols):
    pr = rows - a.shape[0]
    pc = cols - a.shape[1]
    if pr == 0 and pc == 0:
        return a
    return jnp.pad(a, ((0, pr), (0, pc)))


def _fold_bn(sum_v, ssq_v, gamma, beta, n):
    mean = sum_v / n
    var = jnp.maximum(ssq_v / n - mean * mean, 0.0)   # one-pass variance, clamped at 0
    scale = gamma * lax.rsqrt(var + BN_EPS)
    shift = beta - mean * scale
    return scale, shift


def projection_head_forward(x, w1, g1, b1, w2, g2, b2, *, block_rows=256):
    """Forward pass of the nonlinear ProjectionHead.

    x : (N, Din) float32. w1: (Din, H), w2: (H, Dout) pre-transposed (in, out) weights,
    no bias. g*/b*: (1, F) BatchNorm1d affine params. Returns (N, Dout) float32.
    """
    n, d_in = x.shape
    d_hid = w1.shape[1]
    d_out = w2.shape[1]
    assert w1.shape[0] == d_in and w2.shape[0] == d_hid

    # Lane-dense feature dims; batch padded to a multiple of the row tile.
    d_in_p = _round_up(d_in, _LANE)
    d_hid_p = _round_up(d_hid, _LANE)
    d_out_p = _round_up(d_out, _LANE)
    tn = max(_SUBLANE, min(_round_up(block_rows, _SUBLANE), _round_up(n, _SUBLANE)))
    n_p = _round_up(n, tn)
    num_tiles = n_p // tn

    f32, bf16 = jnp.float32, jnp.bfloat16

    x_p = _pad2(x.astype(f32), n_p, d_in_p).astype(bf16)
    w1_p = _pad2(w1.astype(f32), d_in_p, d_hid_p).astype(bf16)
    w2_p = _pad2(w2.astype(f32), d_hid_p, d_out_p).astype(bf16)
    g1_p = _pad2(g1.astype(f32), 1, d_hid_p)
    b1_p = _pad2(b1.astype(f32), 1, d_hid_p)
    g2_p = _pad2(g2.astype(f32), 1, d_out_p)
    b2_p = _pad2(b2.astype(f32), 1, d_out_p)

    compiler_arb = pltpu.CompilerParams(
        dimension_semantics=("arbitrary",), vmem_limit_bytes=_VMEM_LIMIT_BYTES)
    compiler_par = pltpu.CompilerParams(
        dimension_semantics=("parallel",), vmem_limit_bytes=_VMEM_LIMIT_BYTES)

    vec_h = jax.ShapeDtypeStruct((1, d_hid_p), f32)
    vec_o = jax.ShapeDtypeStruct((1, d_out_p), f32)

    # ---- Stage A ----
    ce_a = pl.CostEstimate(
        flops=2 * n_p * d_in_p * d_hid_p,
        transcendentals=0,
        bytes_accessed=(n_p * d_in_p * 2 + d_in_p * d_hid_p * 2
                        + n_p * d_hid_p * 4 + 2 * d_hid_p * 4))
    h, sum1, ssq1 = pl.pallas_call(
        _fc1_stats_kernel,
        grid=(num_tiles,),
        in_specs=[
            pl.BlockSpec((tn, d_in_p), lambda i: (i, 0)),
            pl.BlockSpec((d_in_p, d_hid_p), lambda i: (0, 0)),   # VMEM-resident weight
        ],
        out_specs=(
            pl.BlockSpec((tn, d_hid_p), lambda i: (i, 0)),
            pl.BlockSpec((1, d_hid_p), lambda i: (0, 0)),        # resident stat accumulators
            pl.BlockSpec((1, d_hid_p), lambda i: (0, 0)),
        ),
        out_shape=(jax.ShapeDtypeStruct((n_p, d_hid_p), f32), vec_h, vec_h),
        compiler_params=compiler_arb,
        cost_estimate=ce_a,
    )(x_p, w1_p)

    s1, t1 = _fold_bn(sum1, ssq1, g1_p, b1_p, n)

    # ---- Stage B ----
    ce_b = pl.CostEstimate(
        flops=2 * n_p * d_hid_p * d_out_p + 3 * n_p * d_hid_p,
        transcendentals=0,
        bytes_accessed=(n_p * d_hid_p * 4 + 2 * d_hid_p * 4 + d_hid_p * d_out_p * 2
                        + n_p * d_out_p * 4 + 2 * d_out_p * 4))
    kern_b = functools.partial(
        _bn_relu_fc2_stats_kernel,
        tile_rows=tn,
        n_valid=(n if n_p != n else None))
    z, sum2, ssq2 = pl.pallas_call(
        kern_b,
        grid=(num_tiles,),
        in_specs=[
            pl.BlockSpec((tn, d_hid_p), lambda i: (i, 0)),
            pl.BlockSpec((1, d_hid_p), lambda i: (0, 0)),
            pl.BlockSpec((1, d_hid_p), lambda i: (0, 0)),
            pl.BlockSpec((d_hid_p, d_out_p), lambda i: (0, 0)),  # VMEM-resident weight
        ],
        out_specs=(
            pl.BlockSpec((tn, d_out_p), lambda i: (i, 0)),
            pl.BlockSpec((1, d_out_p), lambda i: (0, 0)),
            pl.BlockSpec((1, d_out_p), lambda i: (0, 0)),
        ),
        out_shape=(jax.ShapeDtypeStruct((n_p, d_out_p), f32), vec_o, vec_o),
        compiler_params=compiler_arb,
        cost_estimate=ce_b,
    )(h, s1, t1, w2_p)

    s2, t2 = _fold_bn(sum2, ssq2, g2_p, b2_p, n)

    # ---- Stage C ----
    ce_c = pl.CostEstimate(
        flops=2 * n_p * d_out_p,
        transcendentals=0,
        bytes_accessed=2 * n_p * d_out_p * 4 + 2 * d_out_p * 4)
    out_p = pl.pallas_call(
        _bn_affine_kernel,
        grid=(num_tiles,),
        in_specs=[
            pl.BlockSpec((tn, d_out_p), lambda i: (i, 0)),
            pl.BlockSpec((1, d_out_p), lambda i: (0, 0)),
            pl.BlockSpec((1, d_out_p), lambda i: (0, 0)),
        ],
        out_specs=pl.BlockSpec((tn, d_out_p), lambda i: (i, 0)),
        out_shape=jax.ShapeDtypeStruct((n_p, d_out_p), f32),
        compiler_params=compiler_par,
        cost_estimate=ce_c,
    )(z, s2, t2)

    return out_p[:n, :d_out]


def _reference_forward(x, w1, g1, b1, w2, g2, b2):
    """Pure-JAX reference (PyTorch training-mode semantics).  Matmul operands are cast to
    bf16 (f32 accumulation) to mirror the kernel's MXU precision choice; BN math is f32."""
    bf16 = jnp.bfloat16
    h = jnp.dot(x.astype(bf16), w1.astype(bf16), preferred_element_type=jnp.float32)
    m, v = jnp.mean(h, axis=0), jnp.var(h, axis=0)
    h = (h - m) * lax.rsqrt(v + BN_EPS) * g1[0] + b1[0]
    h = jnp.maximum(h, 0.0)
    z = jnp.dot(h.astype(bf16), w2.astype(bf16), preferred_element_type=jnp.float32)
    m, v = jnp.mean(z, axis=0), jnp.var(z, axis=0)
    return (z - m) * lax.rsqrt(v + BN_EPS) * g2[0] + b2[0]


def _make_case(key, n, d_in, d_hid, d_out):
    kx, kw1, kw2, kg1, kb1, kg2, kb2 = jax.random.split(key, 7)
    x = jax.random.normal(kx, (n, d_in), dtype=jnp.float32)
    # PyTorch stores Linear weights as (out, in); we keep them pre-transposed (in, out).
    bound1 = 1.0 / jnp.sqrt(d_in)
    w1 = jax.random.uniform(kw1, (d_in, d_hid), jnp.float32, -bound1, bound1)
    bound2 = 1.0 / jnp.sqrt(d_hid)
    w2 = jax.random.uniform(kw2, (d_hid, d_out), jnp.float32, -bound2, bound2)
    g1 = 1.0 + 0.1 * jax.random.normal(kg1, (1, d_hid), jnp.float32)
    b1 = 0.1 * jax.random.normal(kb1, (1, d_hid), jnp.float32)
    g2 = 1.0 + 0.1 * jax.random.normal(kg2, (1, d_out), jnp.float32)
    b2 = 0.1 * jax.random.normal(kb2, (1, d_out), jnp.float32)
    return x, w1, g1, b1, w2, g2, b2


if __name__ == "__main__":
    key = jax.random.PRNGKey(0)
    k1, k2 = jax.random.split(key)

    cases = [
        # Lane-aligned shapes: 2 batch tiles, no padding path.
        dict(key=k1, n=64, d_in=128, d_hid=256, d_out=128, block_rows=32),
        # Ragged shapes: wrapper pads features to 128 / batch to the tile, masks stats.
        dict(key=k2, n=50, d_in=96, d_hid=160, d_out=72, block_rows=16),
    ]

    for cfg in cases:
        args = _make_case(cfg["key"], cfg["n"], cfg["d_in"], cfg["d_hid"], cfg["d_out"])
        fwd = jax.jit(functools.partial(projection_head_forward,
                                        block_rows=cfg["block_rows"]))
        out = jax.block_until_ready(fwd(*args))
        ref = _reference_forward(*args)
        assert out.shape == (cfg["n"], cfg["d_out"]), out.shape
        err = float(jnp.max(jnp.abs(out - ref)))
        assert jnp.allclose(out, ref, atol=1e-2, rtol=1e-2), ("mismatch vs reference", err)

    print("KERNEL_OK")
</pallas_src>

<mosaic_0001>
module attributes {stable_mosaic.version = 11 : i64} {
  func.func @_fc1_stats_kernel(%arg0: i32, %arg1: memref<32x128xbf16, #tpu.memory_space<vmem>>, %arg2: memref<128x256xbf16, #tpu.memory_space<vmem>>, %arg3: memref<32x256xf32, #tpu.memory_space<vmem>>, %arg4: memref<1x256xf32, #tpu.memory_space<vmem>>, %arg5: memref<1x256xf32, #tpu.memory_space<vmem>>) attributes {dimension_semantics = [#tpu.dimension_semantics<arbitrary>], iteration_bounds = array<i64: 2>, scalar_prefetch = 0 : i64, scratch_operands = 0 : i64, tpu.core_type = #tpu.core_type<tc>, window_params = [{transform_indices = @transform_0, window_bounds = array<i64: 32, 128>}, {pipeline_mode = #tpu.pipeline_mode<synchronous>, transform_indices = @transform_1, window_bounds = array<i64: 128, 256>}, {transform_indices = @transform_2, window_bounds = array<i64: 32, 256>}, {pipeline_mode = #tpu.pipeline_mode<synchronous>, transform_indices = @transform_3, window_bounds = array<i64: 1, 256>}, {pipeline_mode = #tpu.pipeline_mode<synchronous>, transform_indices = @transform_4, window_bounds = array<i64: 1, 256>}]} {
    %c0 = arith.constant 0 : index
    %c0_0 = arith.constant 0 : index
    %0 = vector.load %arg1[%c0, %c0_0] : memref<32x128xbf16, #tpu.memory_space<vmem>>, vector<32x128xbf16>
    %c0_1 = arith.constant 0 : index
    %c0_2 = arith.constant 0 : index
    %1 = vector.load %arg2[%c0_1, %c0_2] : memref<128x256xbf16, #tpu.memory_space<vmem>>, vector<128x256xbf16>
    %cst = arith.constant dense<0.000000e+00> : vector<32x256xf32>
    %2 = tpu.matmul %0, %1, %cst {dimension_numbers = #tpu.dot_dimension_numbers<[1], [0], [0], [1], [0, 0, 1, 1], [], []>} : vector<32x128xbf16>, vector<128x256xbf16>, vector<32x256xf32> -> vector<32x256xf32>
    %c0_3 = arith.constant 0 : index
    %c0_4 = arith.constant 0 : index
    %3 = vector.load %arg3[%c0_3, %c0_4] : memref<32x256xf32, #tpu.memory_space<vmem>>, vector<32x256xf32>
    tpu.vector_store %arg3[%c0_3, %c0_4], %2 {strides = array<i32>} : memref<32x256xf32, #tpu.memory_space<vmem>>, vector<32x256xf32>,
    %c0_i32 = arith.constant 0 : i32
    %4 = arith.cmpi eq, %arg0, %c0_i32 : i32
    %5 = arith.extui %4 : i1 to i32
    %c0_i32_5 = arith.constant 0 : i32
    %6 = arith.cmpi ne, %5, %c0_i32_5 : i32
    scf.if %6 {
      %cst_16 = arith.constant 0.000000e+00 : f32
      %18 = vector.broadcast %cst_16 : f32 to vector<1x256xf32>
      %c0_17 = arith.constant 0 : index
      %c0_18 = arith.constant 0 : index
      %19 = vector.load %arg4[%c0_17, %c0_18] : memref<1x256xf32, #tpu.memory_space<vmem>>, vector<1x256xf32>
      tpu.vector_store %arg4[%c0_17, %c0_18], %18 {strides = array<i32>} : memref<1x256xf32, #tpu.memory_space<vmem>>, vector<1x256xf32>,
      %cst_19 = arith.constant 0.000000e+00 : f32
      %20 = vector.broadcast %cst_19 : f32 to vector<1x256xf32>
      %c0_20 = arith.constant 0 : index
      %c0_21 = arith.constant 0 : index
      %21 = vector.load %arg5[%c0_20, %c0_21] : memref<1x256xf32, #tpu.memory_space<vmem>>, vector<1x256xf32>
      tpu.vector_store %arg5[%c0_20, %c0_21], %20 {strides = array<i32>} : memref<1x256xf32, #tpu.memory_space<vmem>>, vector<1x256xf32>,
    } else {
    }
    %c0_6 = arith.constant 0 : index
    %c0_7 = arith.constant 0 : index
    %7 = vector.load %arg4[%c0_6, %c0_7] : memref<1x256xf32, #tpu.memory_space<vmem>>, vector<1x256xf32>
    %cst_8 = arith.constant dense<0.000000e+00> : vector<256xf32>
    %8 = vector.multi_reduction <add>, %2, %cst_8 [0] : vector<32x256xf32> to vector<256xf32>
    %9 = vector.shape_cast %8 : vector<256xf32> to vector<1x256xf32>
    %10 = arith.addf %7, %9 : vector<1x256xf32>
    %c0_9 = arith.constant 0 : index
    %c0_10 = arith.constant 0 : index
    %11 = vector.load %arg4[%c0_9, %c0_10] : memref<1x256xf32, #tpu.memory_space<vmem>>, vector<1x256xf32>
    tpu.vector_store %arg4[%c0_9, %c0_10], %10 {strides = array<i32>} : memref<1x256xf32, #tpu.memory_space<vmem>>, vector<1x256xf32>,
    %c0_11 = arith.constant 0 : index
    %c0_12 = arith.constant 0 : index
    %12 = vector.load %arg5[%c0_11, %c0_12] : memref<1x256xf32, #tpu.memory_space<vmem>>, vector<1x256xf32>
    %13 = arith.mulf %2, %2 : vector<32x256xf32>
    %cst_13 = arith.constant dense<0.000000e+00> : vector<256xf32>
    %14 = vector.multi_reduction <add>, %13, %cst_13 [0] : vector<32x256xf32> to vector<256xf32>
    %15 = vector.shape_cast %14 : vector<256xf32> to vector<1x256xf32>
    %16 = arith.addf %12, %15 : vector<1x256xf32>
    %c0_14 = arith.constant 0 : index
    %c0_15 = arith.constant 0 : index
    %17 = vector.load %arg5[%c0_14, %c0_15] : memref<1x256xf32, #tpu.memory_space<vmem>>, vector<1x256xf32>
    tpu.vector_store %arg5[%c0_14, %c0_15], %16 {strides = array<i32>} : memref<1x256xf32, #tpu.memory_space<vmem>>, vector<1x256xf32>,
    return
  }
  func.func @transform_0(%arg0: i32) -> (i32, i32) {
    %c0_i32 = arith.constant 0 : i32
    %c0_i32_0 = arith.constant 0 : i32
    return %arg0, %c0_i32 : i32, i32
  }
  func.func @transform_1(%arg0: i32) -> (i32, i32) {
    %c0_i32 = arith.constant 0 : i32
    %c0_i32_0 = arith.constant 0 : i32
    %c0_i32_1 = arith.constant 0 : i32
    return %c0_i32, %c0_i32_0 : i32, i32
  }
  func.func @transform_2(%arg0: i32) -> (i32, i32) {
    %c0_i32 = arith.constant 0 : i32
    %c0_i32_0 = arith.constant 0 : i32
    return %arg0, %c0_i32 : i32, i32
  }
  func.func @transform_3(%arg0: i32) -> (i32, i32) {
    %c0_i32 = arith.constant 0 : i32
    %c0_i32_0 = arith.constant 0 : i32
    %c0_i32_1 = arith.constant 0 : i32
    return %c0_i32, %c0_i32_0 : i32, i32
  }
  func.func @transform_4(%arg0: i32) -> (i32, i32) {
    %c0_i32 = arith.constant 0 : i32
    %c0_i32_0 = arith.constant 0 : i32
    %c0_i32_1 = arith.constant 0 : i32
    return %c0_i32, %c0_i32_0 : i32, i32
  }
}

module attributes {stable_mosaic.version = 11 : i64} {
  func.func @_bn_affine_kernel(%arg0: i32, %arg1: memref<32x128xf32, #tpu.memory_space<vmem>>, %arg2: memref<1x128xf32, #tpu.memory_space<vmem>>, %arg3: memref<1x128xf32, #tpu.memory_space<vmem>>, %arg4: memref<32x128xf32, #tpu.memory_space<vmem>>) attributes {dimension_semantics = [#tpu.dimension_semantics<parallel>], iteration_bounds = array<i64: 2>, scalar_prefetch = 0 : i64, scratch_operands = 0 : i64, tpu.core_type = #tpu.core_type<tc>, window_params = [{transform_indices = @transform_0, window_bounds = array<i64: 32, 128>}, {pipeline_mode = #tpu.pipeline_mode<synchronous>, transform_indices = @transform_1, window_bounds = array<i64: 1, 128>}, {pipeline_mode = #tpu.pipeline_mode<synchronous>, transform_indices = @transform_2, window_bounds = array<i64: 1, 128>}, {transform_indices = @transform_3, window_bounds = array<i64: 32, 128>}]} {
    %c0 = arith.constant 0 : index
    %c0_0 = arith.constant 0 : index
    %0 = vector.load %arg1[%c0, %c0_0] : memref<32x128xf32, #tpu.memory_space<vmem>>, vector<32x128xf32>
    %c0_1 = arith.constant 0 : index
    %c0_2 = arith.constant 0 : index
    %1 = vector.load %arg2[%c0_1, %c0_2] : memref<1x128xf32, #tpu.memory_space<vmem>>, vector<1x128xf32>
    %2 = vector.broadcast %1 : vector<1x128xf32> to vector<32x128xf32>
    %3 = arith.mulf %0, %2 : vector<32x128xf32>
    %c0_3 = arith.constant 0 : index
    %c0_4 = arith.constant 0 : index
    %4 = vector.load %arg3[%c0_3, %c0_4] : memref<1x128xf32, #tpu.memory_space<vmem>>, vector<1x128xf32>
    %5 = vector.broadcast %4 : vector<1x128xf32> to vector<32x128xf32>
    %6 = arith.addf %3, %5 : vector<32x128xf32>
    %c0_5 = arith.constant 0 : index
    %c0_6 = arith.constant 0 : index
    %7 = vector.load %arg4[%c0_5, %c0_6] : memref<32x128xf32, #tpu.memory_space<vmem>>, vector<32x128xf32>
    tpu.vector_store %arg4[%c0_5, %c0_6], %6 {strides = array<i32>} : memref<32x128xf32, #tpu.memory_space<vmem>>, vector<32x128xf32>,
    return
  }
  func.func @transform_0(%arg0: i32) -> (i32, i32) {
    %c0_i32 = arith.constant 0 : i32
    %c0_i32_0 = arith.constant 0 : i32
    return %arg0, %c0_i32 : i32, i32
  }
  func.func @transform_1(%arg0: i32) -> (i32, i32) {
    %c0_i32 = arith.constant 0 : i32
    %c0_i32_0 = arith.constant 0 : i32
    %c0_i32_1 = arith.constant 0 : i32
    return %c0_i32, %c0_i32_0 : i32, i32
  }
  func.func @transform_2(%arg0: i32) -> (i32, i32) {
    %c0_i32 = arith.constant 0 : i32
    %c0_i32_0 = arith.constant 0 : i32
    %c0_i32_1 = arith.constant 0 : i32
    return %c0_i32, %c0_i32_0 : i32, i32
  }
  func.func @transform_3(%arg0: i32) -> (i32, i32) {
    %c0_i32 = arith.constant 0 : i32
    %c0_i32_0 = arith.constant 0 : i32
    return %arg0, %c0_i32 : i32, i32
  }
}

module attributes {stable_mosaic.version = 11 : i64} {
  func.func @_bn_relu_fc2_stats_kernel(%arg0: i32, %arg1: memref<32x256xf32, #tpu.memory_space<vmem>>, %arg2: memref<1x256xf32, #tpu.memory_space<vmem>>, %arg3: memref<1x256xf32, #tpu.memory_space<vmem>>, %arg4: memref<256x128xbf16, #tpu.memory_space<vmem>>, %arg5: memref<32x128xf32, #tpu.memory_space<vmem>>, %arg6: memref<1x128xf32, #tpu.memory_space<vmem>>, %arg7: memref<1x128xf32, #tpu.memory_space<vmem>>) attributes {dimension_semantics = [#tpu.dimension_semantics<arbitrary>], iteration_bounds = array<i64: 2>, scalar_prefetch = 0 : i64, scratch_operands = 0 : i64, tpu.core_type = #tpu.core_type<tc>, window_params = [{transform_indices = @transform_0, window_bounds = array<i64: 32, 256>}, {pipeline_mode = #tpu.pipeline_mode<synchronous>, transform_indices = @transform_1, window_bounds = array<i64: 1, 256>}, {pipeline_mode = #tpu.pipeline_mode<synchronous>, transform_indices = @transform_2, window_bounds = array<i64: 1, 256>}, {pipeline_mode = #tpu.pipeline_mode<synchronous>, transform_indices = @transform_3, window_bounds = array<i64: 256, 128>}, {transform_indices = @transform_4, window_bounds = array<i64: 32, 128>}, {pipeline_mode = #tpu.pipeline_mode<synchronous>, transform_indices = @transform_5, window_bounds = array<i64: 1, 128>}, {pipeline_mode = #tpu.pipeline_mode<synchronous>, transform_indices = @transform_6, window_bounds = array<i64: 1, 128>}]} {
    %c0 = arith.constant 0 : index
    %c0_0 = arith.constant 0 : index
    %0 = vector.load %arg1[%c0, %c0_0] : memref<32x256xf32, #tpu.memory_space<vmem>>, vector<32x256xf32>
    %c0_1 = arith.constant 0 : index
    %c0_2 = arith.constant 0 : index
    %1 = vector.load %arg2[%c0_1, %c0_2] : memref<1x256xf32, #tpu.memory_space<vmem>>, vector<1x256xf32>
    %2 = vector.broadcast %1 : vector<1x256xf32> to vector<32x256xf32>
    %3 = arith.mulf %0, %2 : vector<32x256xf32>
    %c0_3 = arith.constant 0 : index
    %c0_4 = arith.constant 0 : index
    %4 = vector.load %arg3[%c0_3, %c0_4] : memref<1x256xf32, #tpu.memory_space<vmem>>, vector<1x256xf32>
    %5 = vector.broadcast %4 : vector<1x256xf32> to vector<32x256xf32>
    %6 = arith.addf %3, %5 : vector<32x256xf32>
    %cst = arith.constant 0.000000e+00 : f32
    %7 = vector.broadcast %cst : f32 to vector<32x256xf32>
    %8 = arith.maximumf %6, %7 : vector<32x256xf32>
    %9 = arith.truncf %8 : vector<32x256xf32> to vector<32x256xbf16>
    %c0_5 = arith.constant 0 : index
    %c0_6 = arith.constant 0 : index
    %10 = vector.load %arg4[%c0_5, %c0_6] : memref<256x128xbf16, #tpu.memory_space<vmem>>, vector<256x128xbf16>
    %cst_7 = arith.constant dense<0.000000e+00> : vector<32x128xf32>
    %11 = tpu.matmul %9, %10, %cst_7 {dimension_numbers = #tpu.dot_dimension_numbers<[1], [0], [0], [1], [0, 0, 1, 1], [], []>} : vector<32x256xbf16>, vector<256x128xbf16>, vector<32x128xf32> -> vector<32x128xf32>
    %c0_8 = arith.constant 0 : index
    %c0_9 = arith.constant 0 : index
    %12 = vector.load %arg5[%c0_8, %c0_9] : memref<32x128xf32, #tpu.memory_space<vmem>>, vector<32x128xf32>
    tpu.vector_store %arg5[%c0_8, %c0_9], %11 {strides = array<i32>} : memref<32x128xf32, #tpu.memory_space<vmem>>, vector<32x128xf32>,
    %c0_i32 = arith.constant 0 : i32
    %13 = arith.cmpi eq, %arg0, %c0_i32 : i32
    %14 = arith.extui %13 : i1 to i32
    %c0_i32_10 = arith.constant 0 : i32
    %15 = arith.cmpi ne, %14, %c0_i32_10 : i32
    scf.if %15 {
      %cst_21 = arith.constant 0.000000e+00 : f32
      %27 = vector.broadcast %cst_21 : f32 to vector<1x128xf32>
      %c0_22 = arith.constant 0 : index
      %c0_23 = arith.constant 0 : index
      %28 = vector.load %arg6[%c0_22, %c0_23] : memref<1x128xf32, #tpu.memory_space<vmem>>, vector<1x128xf32>
      tpu.vector_store %arg6[%c0_22, %c0_23], %27 {strides = array<i32>} : memref<1x128xf32, #tpu.memory_space<vmem>>, vector<1x128xf32>,
      %cst_24 = arith.constant 0.000000e+00 : f32
      %29 = vector.broadcast %cst_24 : f32 to vector<1x128xf32>
      %c0_25 = arith.constant 0 : index
      %c0_26 = arith.constant 0 : index
      %30 = vector.load %arg7[%c0_25, %c0_26] : memref<1x128xf32, #tpu.memory_space<vmem>>, vector<1x128xf32>
      tpu.vector_store %arg7[%c0_25, %c0_26], %29 {strides = array<i32>} : memref<1x128xf32, #tpu.memory_space<vmem>>, vector<1x128xf32>,
    } else {
    }
    %c0_11 = arith.constant 0 : index
    %c0_12 = arith.constant 0 : index
    %16 = vector.load %arg6[%c0_11, %c0_12] : memref<1x128xf32, #tpu.memory_space<vmem>>, vector<1x128xf32>
    %cst_13 = arith.constant dense<0.000000e+00> : vector<128xf32>
    %17 = vector.multi_reduction <add>, %11, %cst_13 [0] : vector<32x128xf32> to vector<128xf32>
    %18 = vector.shape_cast %17 : vector<128xf32> to vector<1x128xf32>
    %19 = arith.addf %16, %18 : vector<1x128xf32>
    %c0_14 = arith.constant 0 : index
    %c0_15 = arith.constant 0 : index
    %20 = vector.load %arg6[%c0_14, %c0_15] : memref<1x128xf32, #tpu.memory_space<vmem>>, vector<1x128xf32>
    tpu.vector_store %arg6[%c0_14, %c0_15], %19 {strides = array<i32>} : memref<1x128xf32, #tpu.memory_space<vmem>>, vector<1x128xf32>,
    %c0_16 = arith.constant 0 : index
    %c0_17 = arith.constant 0 : index
    %21 = vector.load %arg7[%c0_16, %c0_17] : memref<1x128xf32, #tpu.memory_space<vmem>>, vector<1x128xf32>
    %22 = arith.mulf %11, %11 : vector<32x128xf32>
    %cst_18 = arith.constant dense<0.000000e+00> : vector<128xf32>
    %23 = vector.multi_reduction <add>, %22, %cst_18 [0] : vector<32x128xf32> to vector<128xf32>
    %24 = vector.shape_cast %23 : vector<128xf32> to vector<1x128xf32>
    %25 = arith.addf %21, %24 : vector<1x128xf32>
    %c0_19 = arith.constant 0 : index
    %c0_20 = arith.constant 0 : index
    %26 = vector.load %arg7[%c0_19, %c0_20] : memref<1x128xf32, #tpu.memory_space<vmem>>, vector<1x128xf32>
    tpu.vector_store %arg7[%c0_19, %c0_20], %25 {strides = array<i32>} : memref<1x128xf32, #tpu.memory_space<vmem>>, vector<1x128xf32>,
    return
  }
  func.func @transform_0(%arg0: i32) -> (i32, i32) {
    %c0_i32 = arith.constant 0 : i32
    %c0_i32_0 = arith.constant 0 : i32
    return %arg0, %c0_i32 : i32, i32
  }
  func.func @transform_1(%arg0: i32) -> (i32, i32) {
    %c0_i32 = arith.constant 0 : i32
    %c0_i32_0 = arith.constant 0 : i32
    %c0_i32_1 = arith.constant 0 : i32
    return %c0_i32, %c0_i32_0 : i32, i32
  }
  func.func @transform_2(%arg0: i32) -> (i32, i32) {
    %c0_i32 = arith.constant 0 : i32
    %c0_i32_0 = arith.constant 0 : i32
    %c0_i32_1 = arith.constant 0 : i32
    return %c0_i32, %c0_i32_0 : i32, i32
  }
  func.func @transform_3(%arg0: i32) -> (i32, i32) {
    %c0_i32 = arith.constant 0 : i32
    %c0_i32_0 = arith.constant 0 : i32
    %c0_i32_1 = arith.constant 0 : i32
    return %c0_i32, %c0_i32_0 : i32, i32
  }
  func.func @transform_4(%arg0: i32) -> (i32, i32) {
    %c0_i32 = arith.constant 0 : i32
    %c0_i32_0 = arith.constant 0 : i32
    return %arg0, %c0_i32 : i32, i32
  }
  func.func @transform_5(%arg0: i32) -> (i32, i32) {
    %c0_i32 = arith.constant 0 : i32
    %c0_i32_0 = arith.constant 0 : i32
    %c0_i32_1 = arith.constant 0 : i32
    return %c0_i32, %c0_i32_0 : i32, i32
  }
  func.func @transform_6(%arg0: i32) -> (i32, i32) {
    %c0_i32 = arith.constant 0 : i32
    %c0_i32_0 = arith.constant 0 : i32
    %c0_i32_1 = arith.constant 0 : i32
    return %c0_i32, %c0_i32_0 : i32, i32
  }
}

</mosaic_0001>

<bundles_post_ra>
// kernel: projection_head_forward.5
= control target key start
LH: loop header
LB: loop body
LE: loop exit
PB: predicated region body
PF: predicated region fallthrough
CT: control target
= control target key end

     0   :  { %8 = vsyncpa [#allocation3], 0  ;;  %s533_s0 = inlined_call_operand.vmem [shape: f32[64,128], index: 0, kind: input, shape index: {}]   ;;  %s534_s1 = inlined_call_operand.vmem [shape: f32[1,128], index: 1, kind: input, shape index: {}]   ;;  %s535_s2 = inlined_call_operand.vmem [shape: f32[1,128], index: 2, kind: input, shape index: {}]   ;;  %s536_s3 = inlined_call_operand.hbm [shape: f32[64,128], index: 3, kind: output, shape index: {}]  }
   0x1   :  { %10 = vsyncpa [#allocation3 + $0x1], 0  ;;  %s421_s12 = smov 0   ;;  %s423_s13 = smov 0  }
   0x2   :  { %s425_s14 = smov 0   ;;  %s427_s15 = smov 0  }
   0x3 LB: > { %s442_s16 = sadd.s32 4294967295, %s396_s15   ;;  %s278_s17 = sadd.s32 4294967294, %s396_s15   ;;  %s396_s15 = sphi %s427_s15, %s542_s15   ;;  %s392_s14 = sphi %s425_s14, %s541_s14   ;;  %s388_s13 = sphi %s423_s13, %s540_s13   ;;  %s384_s12 = sphi %s421_s12, %s539_s12  }
   0x4   : > { %s446_s18 = sadd.s32 1, %s396_s15   ;;  %s91_s19 = sadd.s32 1, %s392_s14 }
   0x5   : > { %s88_s20 = ssub.s32 %s396_s15, %s446_s18  ;;  %p101_p0 = scmp.ne.s32.totalorder %s392_s14, %s388_s13 }
   0x6   : > { %p89_p1 = scmp.eq.s32.totalorder %s88_s20, 0  ;;  %p102_p2 = scmp.eq.s32.totalorder %s442_s16, 1 }
   0x7   : > { %p107_p3 = scmp.ne.s32.totalorder %s388_s13, %s384_s12  ;;  %p108_p4 = scmp.eq.s32.totalorder %s278_s17, 1 }
   0x8   : > { %s457_s21 = scalar_select %p89_p1, %s392_s14, %s91_s19  }
   0x9   : > { %p459_p5 = por %p102_p2, %p101_p0  ;;  %p463_p6 = por %p108_p4, %p107_p3 }
   0xa   : > { %p281_p7 = scmp.ge.s32.totalorder %s396_s15, 1  ;;  %p141_p8 = scmp.lt.s32.totalorder %s396_s15, 3 }
   0xc   : > { %p142_p9 = pnand %p281_p7, %p141_p8 }
   0xd   : > { %s162_s24 = sand.u32 (!%p142_p9), 1, %s388_s13   ;;  %s283_s25 = sshll.u32 (!%p142_p9), %s442_s16, 2  ;;  %v285_v0 = vld [vmem:[%s534_s1] ss:$0 sm:$0xff] (!%p142_p9) }
   0xe   : > { %145 = sbr.rel (%p142_p9) target bundleno = 46 (0x2e), region = 32  ;;  %s282_s26 = sshll.u32 (!%p142_p9), %s162_s24, 5  ;;  %v286_v1 = vld [vmem:[%s535_s2] ss:$0 sm:$0xff] (!%p142_p9) }
   0xf   : > { %p166_p10 = scmp.lt.s32.totalorder (!%p142_p9), %s283_s25, 7  ;;  %s164_s8 = scalar_lea.vmem (!%p142_p9), [#allocation2], %s282_s26 }
  0x10   : > { %s216_s9 = sshll.u32 (!%p142_p9), %s164_s8, 4  ;;  %s292_s10 = sshll.u32 (!%p142_p9), %s442_s16, 9  ;;  %s483_s9 = int_to_ptr.vmem [resolvable:$true] %s216_s9 }
  0x11   : > { %s488_s19 = scalar_lea.hbm (!%p142_p9), %s536_s3, %s292_s10  ;;  %s492_s16 = scalar_lea.sflag (!%p142_p9), [#allocation3], %s162_s24 }
  0x12   : > { %s334_s20 = scalar_lea.vmem (!%p142_p9), %s483_s9, 512 }
  0x13   : > { %p335_p11 = scmp.ne.s32.totalorder (!%p142_p9), %s483_s9, %s334_s20 }
  0x15   : > { %s544_s25 = smov (!%p166_p10, %s283_s25), 7  ;;  %p336_p12 = pnand %p335_p11, %p459_p5 }
  0x16   : > { %s284_s27 = sshll.u32 %s544_s25, 3  ;;  %s398_s25 = smov [#allocation2]  }
  0x17   : > { %s169_s5 = scalar_lea.vmem %s533_s0, %s284_s27  ;;  %p337_p13 = pneg %p336_p12 }
  0x18   : > { %v172_v2 = vld [vmem:[%s169_s5] sm:$0xff]  ;;  %v173_v3 = vld [vmem:[%s169_s5 + $0x8] sm:$0xff]  ;;  %v174_v4 = vld [vmem:[%s169_s5 + $0x10] sm:$0xff]  ;;  %s338_s26 = sshll.u32 %s398_s25, 4  ;;  %s339_s26 = int_to_ptr.vmem [resolvable:$false] %s338_s26 }
  0x19   : > { %v183_v5 = vmul.f32 %v285_v0, %v172_v2  ;;  %v184_v6 = vmul.f32 %v285_v0, %v173_v3  ;;  %v185_v7 = vmul.f32 %v285_v0, %v174_v4  ;;  %v175_v8 = vld [vmem:[%s169_s5 + $0x18] sm:$0xff]  ;;  %s340_s27 = scalar_lea.vmem %s339_s26, 1024  ;;  %p341_p0 = scmp.lt.s32.totalorder %s483_s9, %s339_s26 }
  0x1a   : > { %v186_v9 = vmul.f32 %v285_v0, %v175_v8  ;;  %p342_p1 = scmp.lt.s32.totalorder %s340_s27, %s334_s20 }
  0x1b   : > { %v194_v10 = vadd.f32 %v286_v1, %v183_v5  ;;  %v195_v11 = vadd.f32 %v286_v1, %v184_v6  ;;  %v196_v12 = vadd.f32 %v286_v1, %v185_v7 }
  0x1c   : > { %v197_v13 = vadd.f32 %v286_v1, %v186_v9  ;;  %p343_p2 = por %p342_p1, %p341_p0 }
  0x1d   : > { %198 = vst [vmem:[%s164_s8] sm:$0xff] %v194_v10  ;;  %199 = vst [vmem:[%s164_s8 + $0x8] sm:$0xff] %v195_v11 }
  0x1e   : > { %200 = vst [vmem:[%s164_s8 + $0x10] sm:$0xff] %v196_v12  ;;  %201 = vst [vmem:[%s164_s8 + $0x18] sm:$0xff] %v197_v13  ;;  %p344_p3 = pnand %p343_p2, %p337_p13 }
  0x20   : > { %347 = shalt.err (!%p344_p3)
}
  0x21   : > { %s348_s24 = scalar_lea.hbm %s488_s19, 512  ;;  %s352_s30 = scalar_lea.hbm %s536_s3, 1024 }
  0x22   : > { %p349_p4 = scmp.ne.s32.totalorder %s488_s19, %s348_s24  ;;  %p353_p9 = scmp.lt.u32.totalorder %s488_s19, %s536_s3 }
  0x23   : > { %p354_p10 = scmp.lt.u32.totalorder %s352_s30, %s348_s24  ;;  %p356_p12 = scmp.lt.u32.totalorder %s348_s24, %s488_s19 }
  0x24   : > { %p350_p7 = pnand %p349_p4, %p459_p5 }
  0x25   : > { %p355_p11 = por %p354_p10, %p353_p9 }
  0x26   : > { %p351_p8 = pneg %p350_p7 }
  0x27   : > { %p357_p13 = por %p356_p12, %p355_p11 }
  0x29   : > { %p358_p0 = pnand %p357_p13, %p351_p8 }
  0x2b   : > { %361 = shalt.err (!%p358_p0)
}
  0x2c   : > { %s399_s6 = smov 128   ;;  %s400_s7 = smov 8  }
  0x2d   : > { %293 = dma.vmem_to_hbm [thread:$0]  (%p459_p5), %s483_s9, 512, %s488_s19, %s492_s16, %s399_s6, %s399_s6, %s400_s7  }
  0x2e PF: > { %p299_p1 = scmp.ge.s32.totalorder %s396_s15, 2  ;;  %s231_s8 = sand.u32 1, %s384_s12  }
  0x2f   : > { %s232_s10 = scalar_lea.sflag [#allocation3], %s231_s8 }
  0x30   : > { %p296_p2 = pnand %p299_p1, %p463_p6 }
  0x32   : > { %379 = dma.done.wait (!%p296_p2), %s232_s10, 512  }
  0x33   : > { %381 = vsyncadd (!%p296_p2), %s232_s10, 4294966784  ;;  %p13_p3 = scmp.ge.s32.totalorder %s446_s18, 4   ;;  %s539_s12 = smov %s388_s13 }
  0x34   : > { %s540_s13 = smov %s392_s14  ;;  %s541_s14 = smov %s457_s21 }
  0x35   : > { %s542_s15 = smov %s446_s18  ;;  %15 = sbr.rel (!%p13_p3) target bundleno = 3 (0x3), region = 67 }
  0x3c   :  { %237 = vsyncpa [#allocation3], 1 }
  0x3d   :  { %239 = vsyncpa [#allocation3 + $0x1], 1 }

// kernel: projection_head_forward.3
= control target key start
LH: loop header
LB: loop body
LE: loop exit
PB: predicated region body
PF: predicated region fallthrough
CT: control target
= control target key end

     0   :  { %s663_s15 = smov 0   ;;  %s758_s0 = inlined_call_operand.vmem [shape: bf16[64,128], index: 0, kind: input, shape index: {}]   ;;  %s759_s1 = inlined_call_operand.vmem [shape: bf16[128,256], index: 1, kind: input, shape index: {}]   ;;  %s760_s2 = inlined_call_operand.vmem [shape: f32[64,256], index: 2, kind: output, shape index: {0}]   ;;  %s761_s3 = inlined_call_operand.vmem [shape: f32[1,256], index: 3, kind: output, shape index: {1}]   ;;  %s762_s4 = inlined_call_operand.vmem [shape: f32[1,256], index: 4, kind: output, shape index: {2}]  }
   0x1 LB: > { %s542_s16 = sadd.s32 4294967295, %s633_s15   ;;  %p546_p0 = scmp.ge.s32.totalorder %s633_s15, 1  ;;  %s633_s15 = sphi %s663_s15, %s15_s15  }
   0x2   : > { %p158_p1 = scmp.lt.s32.totalorder %s633_s15, 3 }
   0x4   : > { %p159_p2 = pnand %p546_p0, %p158_p1 }
   0x5   : > { %v601_v0 = vld [vmem:[%s759_s1 + $0x4] ss:$8 sps:$4 sm:$0xff] (!%p159_p2)   ;;  %s547_s19 = sshll.u32 (!%p159_p2), %s542_s16, 2  ;;  %v603_v1 = vld [vmem:[%s759_s1] ss:$8 sps:$4 sm:$0xff] (!%p159_p2)   ;;  %v635_v2 = vmov (!%p159_p2), 0  }
   0x6   : > { %162 = sbr.rel (%p159_p2) target bundleno = 285 (0x11d), region = 28  ;;  %343 = vmatprep.mubr.bf16.mxu0 (!%p159_p2), %v635_v2  ;;  %353 = vmatprep.mubr.bf16.mxu1 (!%p159_p2), %v635_v2  ;;  %p186_p3 = scmp.lt.s32.totalorder (!%p159_p2), %s547_s19, 7  ;;  %v604_v3 = vld [vmem:[%s759_s1 + $0x14] ss:$8 sps:$4 sm:$0xff] (!%p159_p2)   ;;  %v606_v4 = vld [vmem:[%s759_s1 + $0x10] ss:$8 sps:$4 sm:$0xff] (!%p159_p2)  }
   0x7   : > { %311 = vmatprep.subr.bf16.mxu0 (!%p159_p2), %v601_v0  ;;  %574 = vmatprep.subr.bf16.mxu1 (!%p159_p2), %v601_v0  ;;  %v607_v5 = vld [vmem:[%s759_s1 + $0x24] ss:$8 sps:$4 sm:$0xff] (!%p159_p2)   ;;  %v609_v6 = vld [vmem:[%s759_s1 + $0x20] ss:$8 sps:$4 sm:$0xff] (!%p159_p2)   ;;  %v610_v7 = vld [vmem:[%s759_s1 + $0x34] ss:$8 sps:$4 sm:$0xff] (!%p159_p2)  }
   0x8   : > { %312 = vmatpush1.bf16.msra.mxu0 (!%p159_p2), %v603_v1  ;;  %582 = vmatpush1.bf16.msra.mxu1 (!%p159_p2), %v603_v1  ;;  %v612_v8 = vld [vmem:[%s759_s1 + $0x30] ss:$8 sps:$4 sm:$0xff] (!%p159_p2)   ;;  %v613_v9 = vld [vmem:[%s759_s1 + $0x44] ss:$8 sps:$4 sm:$0xff] (!%p159_p2)   ;;  %v615_v10 = vld [vmem:[%s759_s1 + $0x40] ss:$8 sps:$4 sm:$0xff] (!%p159_p2)  }
   0x9   : > { %313 = vmatprep.subr.bf16.mxu0 (!%p159_p2), %v604_v3  ;;  %575 = vmatprep.subr.bf16.mxu1 (!%p159_p2), %v604_v3  ;;  %v616_v11 = vld [vmem:[%s759_s1 + $0x54] ss:$8 sps:$4 sm:$0xff] (!%p159_p2)   ;;  %v618_v12 = vld [vmem:[%s759_s1 + $0x50] ss:$8 sps:$4 sm:$0xff] (!%p159_p2)   ;;  %v619_v13 = vld [vmem:[%s759_s1 + $0x64] ss:$8 sps:$4 sm:$0xff] (!%p159_p2)  }
   0xa   : > { %v621_v14 = vld [vmem:[%s759_s1 + $0x60] ss:$8 sps:$4 sm:$0xff] (!%p159_p2)   ;;  %v622_v15 = vld [vmem:[%s759_s1 + $0x74] ss:$8 sps:$4 sm:$0xff] (!%p159_p2)   ;;  %v624_v16 = vld [vmem:[%s759_s1 + $0x70] ss:$8 sps:$4 sm:$0xff] (!%p159_p2)  }
   0xb   : > { %p570_p4 = scmp.ne.s32.totalorder (!%p159_p2), %s542_s16, 0 }
   0xc   : > { %314 = vmatpush1.bf16.msra.mxu0 (!%p159_p2), %v606_v4  ;;  %583 = vmatpush1.bf16.msra.mxu1 (!%p159_p2), %v606_v4 }
   0xd   : > { %s764_s19 = smov (!%p186_p3, %s547_s19), 7  ;;  %315 = vmatprep.subr.bf16.mxu0 %v607_v5  ;;  %576 = vmatprep.subr.bf16.mxu1 %v607_v5  ;;  %v376_v27 = vlaneseq (!%p570_p4)  ;;  %v636_v28 = vmov (!%p570_p4), 0.0  }
   0xe   : > { %s548_s28 = sshll.u32 %s764_s19, 2  ;;  %s573_s5 = sshll.u32 %s764_s19, 4 }
   0xf   : > { %s700_s9 = scalar_lea.vmem %s758_s0, %s548_s28  ;;  %s196_s8 = scalar_lea.vmem %s760_s2, %s573_s5  ;;  %vm378_vm0 = vcmp.lt.s32.totalorder (!%p570_p4), %v376_v27, 256 }
  0x10   : > { %316 = vmatpush1.bf16.msra.mxu0 %v609_v6  ;;  %584 = vmatpush1.bf16.msra.mxu1 %v609_v6  ;;  %v625_v17 = vld [vmem:[%s700_s9] sm:$0xff]   ;;  %v626_v18 = vld [vmem:[%s700_s9 + $0x8] sm:$0xff]   ;;  %380 = vst.msk [vmem:[%s761_s3] sm:$0x3] (!%p570_p4), %vm378_vm0, %v636_v28  ;;  %381 = vst.msk [vmem:[%s762_s4] sm:$0x3] (!%p570_p4), %vm378_vm0, %v636_v28 }
  0x11   : > { %317 = vmatprep.subr.bf16.mxu0 %v610_v7  ;;  %577 = vmatprep.subr.bf16.mxu1 %v610_v7 }
  0x14   : > { %318 = vmatpush1.bf16.msra.mxu0 %v612_v8  ;;  %585 = vmatpush1.bf16.msra.mxu1 %v612_v8 }
  0x15   : > { %319 = vmatprep.subr.bf16.mxu0 %v613_v9  ;;  %578 = vmatprep.subr.bf16.mxu1 %v613_v9 }
  0x18   : > { %320 = vmatpush1.bf16.msra.mxu0 %v615_v10  ;;  %586 = vmatpush1.bf16.msra.mxu1 %v615_v10 }
  0x19   : > { %321 = vmatprep.subr.bf16.mxu0 %v616_v11  ;;  %579 = vmatprep.subr.bf16.mxu1 %v616_v11 }
  0x1c   : > { %322 = vmatpush1.bf16.msra.mxu0 %v618_v12  ;;  %587 = vmatpush1.bf16.msra.mxu1 %v618_v12 }
  0x1d   : > { %323 = vmatprep.subr.bf16.mxu0 %v619_v13  ;;  %580 = vmatprep.subr.bf16.mxu1 %v619_v13 }
  0x20   : > { %324 = vmatpush1.bf16.msra.mxu0 %v621_v14  ;;  %588 = vmatpush1.bf16.msra.mxu1 %v621_v14 }
  0x21   : > { %325 = vmatprep.subr.bf16.mxu0 %v622_v15  ;;  %581 = vmatprep.subr.bf16.mxu1 %v622_v15 }
  0x24   : > { %326 = vmatpush1.bf16.msra.mxu0 %v624_v16  ;;  %589 = vmatpush1.bf16.msra.mxu1 %v624_v16 }
  0x27   : > { %344 = vmatmul.mubr.bf16.vlgmr.msra.gmra.mrb[0].mxu0 %v625_v17  ;;  %354 = vmatmul.mubr.bf16.vlgmr.msra.gmra.mrb[0].mxu1 %v626_v18 }
  0xf8   : > { %375 = sbr.rel (%p570_p4) target bundleno = 255 (0xff), region = 32 }
  0xfa   : > { %v345_v19 = vpop.f32.mrb[0].mxu0  ;;  %v355_v20 = vpop.f32.mrb[0].mxu1 }
  0xfb   : > { %364 = vst [vmem:[%s196_s8] sm:$0xff] %v345_v19  ;;  %v347_v21 = vpop.f32.mrb[1].mxu0  ;;  %v357_v22 = vpop.f32.mrb[1].mxu1  ;;  %368 = vst [vmem:[%s196_s8 + $0x20] sm:$0xff] %v355_v20 }
  0xfc   : > { %365 = vst [vmem:[%s196_s8 + $0x8] sm:$0xff] %v347_v21  ;;  %v349_v23 = vpop.f32.mrb[2].mxu0  ;;  %v359_v24 = vpop.f32.mrb[2].mxu1  ;;  %369 = vst [vmem:[%s196_s8 + $0x28] sm:$0xff] %v357_v22 }
  0xfd   : > { %366 = vst [vmem:[%s196_s8 + $0x10] sm:$0xff] %v349_v23  ;;  %v351_v25 = vpop.f32.mrb[3].mxu0  ;;  %v361_v26 = vpop.f32.mrb[3].mxu1  ;;  %370 = vst [vmem:[%s196_s8 + $0x30] sm:$0xff] %v359_v24 }
  0xfe   : > { %367 = vst [vmem:[%s196_s8 + $0x18] sm:$0xff] %v351_v25  ;;  %371 = vst [vmem:[%s196_s8 + $0x38] sm:$0xff] %v361_v26 }
  0xff PF: > { %v383_v29 = vadd.f32 %v349_v23, %v345_v19  ;;  %v392_v30 = vadd.f32 %v351_v25, %v347_v21  ;;  %v426_v31 = vmul.f32 %v345_v19, %v345_v19  ;;  %v427_v32 = vmul.f32 %v347_v21, %v347_v21  ;;  %v382_v15 = vld [vmem:[%s761_s3] sm:$0x3] }
 0x100   : > { %v428_v33 = vmul.f32 %v349_v23, %v349_v23  ;;  %v429_v36 = vmul.f32 %v351_v25, %v351_v25  ;;  %v430_v37 = vmul.f32 %v355_v20, %v355_v20  ;;  %v431_v38 = vmul.f32 %v357_v22, %v357_v22 }
 0x101   : > { %v384_v34 = vadd.f32 %v383_v29, %v355_v20  ;;  %v393_v35 = vadd.f32 %v392_v30, %v357_v22  ;;  %v432_v41 = vmul.f32 %v359_v24, %v359_v24  ;;  %v433_v42 = vmul.f32 %v361_v26, %v361_v26  ;;  %v425_v22 = vld [vmem:[%s762_s4] sm:$0x3] }
 0x102   : > { %v434_v43 = vadd.f32 %v428_v33, %v426_v31  ;;  %v443_v44 = vadd.f32 %v429_v36, %v427_v32  ;;  %v637_v51 = vmov 1966171168   ;;  %v407_v53 = vlaneseq }
 0x103   : > { %v385_v39 = vadd.f32 %v384_v34, %v359_v24  ;;  %v394_v40 = vadd.f32 %v393_v35, %v361_v26  ;;  %v405_v52 = vunpack.c.l.s4 %v637_v51 }
 0x104   : > { %v435_v47 = vadd.f32 %v434_v43, %v430_v37  ;;  %v444_v48 = vadd.f32 %v443_v44, %v431_v38  ;;  %v408_v63 = vshrl.u32 %v407_v53, 7  ;;  %vm422_vm1 = vcmp.lt.s32.totalorder %v407_v53, 256 }
 0x105   : > { %v386_v45 = vrot.slane %v385_v39, 4  ;;  %v395_v46 = vrot.slane %v394_v40, 4  ;;  %v406_v62 = vunpack.c.0.s8 %v405_v52 }
 0x106   : > { %v436_v54 = vadd.f32 %v435_v47, %v432_v41  ;;  %v445_v55 = vadd.f32 %v444_v48, %v433_v42 }
 0x107   : > { %v387_v49 = vadd.f32 %v386_v45, %v385_v39  ;;  %v396_v50 = vadd.f32 %v395_v46, %v394_v40  ;;  %v409_v8 = vsub.s32 %v406_v62, %v408_v63 }
 0x108   : > { %v437_v58 = vrot.slane %v436_v54, 4  ;;  %v446_v59 = vrot.slane %v445_v55, 4 }
 0x109   : > { %v388_v56 = vrot.slane %v387_v49, 2  ;;  %v397_v57 = vrot.slane %v396_v50, 2 }
 0x10a   : > { %v438_v0 = vadd.f32 %v437_v58, %v436_v54  ;;  %v447_v1 = vadd.f32 %v446_v59, %v445_v55 }
 0x10b   : > { %v389_v60 = vadd.f32 %v388_v56, %v387_v49  ;;  %v398_v61 = vadd.f32 %v397_v57, %v396_v50 }
 0x10c   : > { %v439_v4 = vrot.slane %v438_v0, 2  ;;  %v448_v5 = vrot.slane %v447_v1, 2 }
 0x10d   : > { %v390_v2 = vrot.slane %v389_v60, 1  ;;  %v399_v3 = vrot.slane %v398_v61, 1 }
 0x10e   : > { %v440_v9 = vadd.f32 %v439_v4, %v438_v0  ;;  %v449_v10 = vadd.f32 %v448_v5, %v447_v1 }
 0x10f   : > { %v391_v6 = vadd.f32 %v390_v2, %v389_v60  ;;  %v400_v7 = vadd.f32 %v399_v3, %v398_v61 }
 0x110   : > { %v441_v12 = vrot.slane %v440_v9, 1  ;;  %v450_v13 = vrot.slane %v449_v10, 1 }
 0x111   : > { %v403_v11 = vcombine.low %v391_v6, %v400_v7 }
 0x112   : > { %v442_v16 = vadd.f32 %v441_v12, %v440_v9  ;;  %v451_v17 = vadd.f32 %v450_v13, %v449_v10 }
 0x113   : > { %v410_v14 = vrot.slane %v403_v11, %v409_v8 }
 0x114   : > { %v454_v19 = vcombine.low %v442_v16, %v451_v17 }
 0x115   : > { %v417_v18 = vrot.slane %v410_v14, %v409_v8 }
 0x116   : > { %v461_v21 = vrot.slane %v454_v19, %v409_v8 }
 0x117   : > { %v419_v20 = vadd.f32 %v417_v18, %v382_v15 }
 0x118   : > { %v468_v23 = vrot.slane %v461_v21, %v409_v8 }
 0x119   : > { %424 = vst.msk [vmem:[%s761_s3] sm:$0x3] %vm422_vm1, %v419_v20 }
 0x11a   : > { %v470_v24 = vadd.f32 %v468_v23, %v425_v22 }
 0x11c   : > { %471 = vst.msk [vmem:[%s762_s4] sm:$0x3] %vm422_vm1, %v470_v24 }
 0x11d PF: > { %s15_s15 = sadd.s32 1, %s633_s15  }
 0x11e   : > { %p12_p5 = scmp.ge.s32.totalorder %s15_s15, 4  }
 0x120   :  { %14 = sbr.rel (!%p12_p5) target bundleno = 1 (0x1), region = 78 }

// kernel: projection_head_forward.4
= control target key start
LH: loop header
LB: loop body
LE: loop exit
PB: predicated region body
PF: predicated region fallthrough
CT: control target
= control target key end

     0   :  { %s740_s21 = smov 0   ;;  %s837_s0 = inlined_call_operand.vmem [shape: f32[64,256], index: 0, kind: input, shape index: {}]   ;;  %s838_s1 = inlined_call_operand.vmem [shape: f32[1,256], index: 1, kind: input, shape index: {}]   ;;  %s839_s2 = inlined_call_operand.vmem [shape: f32[1,256], index: 2, kind: input, shape index: {}]   ;;  %s840_s3 = inlined_call_operand.vmem [shape: bf16[256,128], index: 3, kind: input, shape index: {}]   ;;  %s841_s4 = inlined_call_operand.vmem [shape: f32[64,128], index: 4, kind: output, shape index: {0}]   ;;  %s842_s5 = inlined_call_operand.vmem [shape: f32[1,128], index: 5, kind: output, shape index: {1}]   ;;  %s843_s6 = inlined_call_operand.vmem [shape: f32[1,128], index: 6, kind: output, shape index: {2}]  }
   0x1 LB: > { %s597_s22 = sadd.s32 4294967295, %s702_s21   ;;  %p601_p0 = scmp.ge.s32.totalorder %s702_s21, 1  ;;  %s702_s21 = sphi %s740_s21, %s17_s21  }
   0x2   : > { %p209_p1 = scmp.lt.s32.totalorder %s702_s21, 3 }
   0x4   : > { %p210_p2 = pnand %p601_p0, %p209_p1 }
   0x5   : > { %v680_v0 = vld [vmem:[%s840_s3 + $0x40] sm:$0xff] (!%p210_p2)   ;;  %s602_s25 = sshll.u32 (!%p210_p2), %s597_s22, 2  ;;  %v682_v2 = vld [vmem:[%s840_s3 + $0x48] sm:$0xff] (!%p210_p2)   ;;  %v684_v4 = vld [vmem:[%s840_s3 + $0x50] sm:$0xff] (!%p210_p2)   ;;  %v264_v5 = vlaneseq (!%p210_p2)  ;;  %p623_p4 = scmp.ne.s32.totalorder (!%p210_p2), %s597_s22, 0 }
   0x6   : > { %213 = sbr.rel (%p210_p2) target bundleno = 279 (0x117), region = 36  ;;  %v681_v1 = vld [vmem:[%s840_s3] sm:$0xff] (!%p210_p2)   ;;  %627 = vmatprep.subr.bf16.mxu0 (!%p210_p2), %v680_v0  ;;  %655 = vmatprep.subr.bf16.mxu1 (!%p210_p2), %v680_v0  ;;  %p241_p3 = scmp.lt.s32.totalorder (!%p210_p2), %s602_s25, 7  ;;  %v683_v3 = vld [vmem:[%s840_s3 + $0x8] sm:$0xff] (!%p210_p2)   ;;  %v685_v6 = vld [vmem:[%s840_s3 + $0x10] sm:$0xff] (!%p210_p2)  }
   0x7   : > { %628 = vmatpush3.bf16.msra.mxu0 (!%p210_p2), %v681_v1  ;;  %663 = vmatpush3.bf16.msra.mxu1 (!%p210_p2), %v681_v1  ;;  %v686_v7 = vld [vmem:[%s840_s3 + $0x58] sm:$0xff] (!%p210_p2)   ;;  %v265_v8 = vshrl.u32 (!%p210_p2), %v264_v5, 7  ;;  %v688_v10 = vld [vmem:[%s840_s3 + $0x60] sm:$0xff] (!%p210_p2)   ;;  %v690_v14 = vld [vmem:[%s840_s3 + $0x68] sm:$0xff] (!%p210_p2)  }
   0x8   : > { %629 = vmatprep.subr.bf16.mxu0 (!%p210_p2), %v682_v2  ;;  %656 = vmatprep.subr.bf16.mxu1 (!%p210_p2), %v682_v2  ;;  %v687_v9 = vld [vmem:[%s840_s3 + $0x18] sm:$0xff] (!%p210_p2)   ;;  %v689_v13 = vld [vmem:[%s840_s3 + $0x20] sm:$0xff] (!%p210_p2)   ;;  %v691_v28 = vld [vmem:[%s840_s3 + $0x28] sm:$0xff] (!%p210_p2)  }
   0x9   : > { %v266_v11 = vsub.s32 (!%p210_p2), 0, %v265_v8  ;;  %v270_v12 = vsub.s32 (!%p210_p2), 1, %v265_v8  ;;  %v262_v17 = vld [vmem:[%s838_s1] sm:$0x3] (!%p210_p2)  ;;  %v692_v33 = vld [vmem:[%s840_s3 + $0x70] sm:$0xff] (!%p210_p2)   ;;  %v694_v50 = vld [vmem:[%s840_s3 + $0x78] sm:$0xff] (!%p210_p2)  }
   0xa   : > { %v282_v20 = vld [vmem:[%s839_s2] sm:$0x3] (!%p210_p2)  ;;  %v693_v45 = vld [vmem:[%s840_s3 + $0x30] sm:$0xff] (!%p210_p2)   ;;  %v695_v59 = vld [vmem:[%s840_s3 + $0x38] sm:$0xff] (!%p210_p2)  }
   0xb   : > { %630 = vmatpush3.bf16.msra.mxu0 (!%p210_p2), %v683_v3  ;;  %664 = vmatpush3.bf16.msra.mxu1 (!%p210_p2), %v683_v3  ;;  %v267_v18 = vrot.slane (!%p210_p2), %v262_v17, %v266_v11  ;;  %v271_v19 = vrot.slane (!%p210_p2), %v262_v17, %v270_v12  ;;  %v287_v23 = vrot.slane (!%p210_p2), %v282_v20, %v266_v11 }
   0xc   : > { %631 = vmatprep.subr.bf16.mxu0 (!%p210_p2), %v684_v4  ;;  %657 = vmatprep.subr.bf16.mxu1 (!%p210_p2), %v684_v4  ;;  %v291_v24 = vrot.slane (!%p210_p2), %v282_v20, %v270_v12 }
   0xd   : > { %s845_s25 = smov (!%p241_p3, %s602_s25), 7 }
   0xe   : > { %s626_s14 = sshll.u32 %s845_s25, 4  ;;  %s606_s19 = sshll.u32 %s845_s25, 3 }
   0xf   : > { %632 = vmatpush3.bf16.msra.mxu0 %v685_v6  ;;  %665 = vmatpush3.bf16.msra.mxu1 %v685_v6  ;;  %s245_s23 = scalar_lea.vmem %s837_s0, %s626_s14  ;;  %s251_s24 = scalar_lea.vmem %s841_s4, %s606_s19 }
  0x10   : > { %633 = vmatprep.subr.bf16.mxu0 %v686_v7  ;;  %658 = vmatprep.subr.bf16.mxu1 %v686_v7  ;;  %v255_v15 = vld [vmem:[%s245_s23 + $0x8] sm:$0xff]  ;;  %v257_v16 = vld [vmem:[%s245_s23 + $0x18] sm:$0xff]  ;;  %v254_v25 = vld [vmem:[%s245_s23] sm:$0xff] }
  0x11   : > { %v259_v21 = vld [vmem:[%s245_s23 + $0x28] sm:$0xff]  ;;  %v261_v22 = vld [vmem:[%s245_s23 + $0x38] sm:$0xff]  ;;  %v256_v26 = vld [vmem:[%s245_s23 + $0x10] sm:$0xff]  ;;  %v275_v29 = vmul.f32 %v271_v19, %v255_v15  ;;  %v277_v30 = vmul.f32 %v271_v19, %v257_v16  ;;  %v274_v35 = vmul.f32 %v267_v18, %v254_v25 }
  0x12   : > { %v258_v27 = vld [vmem:[%s245_s23 + $0x20] sm:$0xff]  ;;  %v279_v31 = vmul.f32 %v271_v19, %v259_v21  ;;  %v260_v32 = vld [vmem:[%s245_s23 + $0x30] sm:$0xff]  ;;  %v281_v34 = vmul.f32 %v271_v19, %v261_v22  ;;  %v276_v36 = vmul.f32 %v267_v18, %v256_v26 }
  0x13   : > { %634 = vmatpush3.bf16.msra.mxu0 %v687_v9  ;;  %666 = vmatpush3.bf16.msra.mxu1 %v687_v9  ;;  %v295_v37 = vadd.f32 %v291_v24, %v275_v29  ;;  %v297_v38 = vadd.f32 %v291_v24, %v277_v30  ;;  %v278_v40 = vmul.f32 %v267_v18, %v258_v27 }
  0x14   : > { %635 = vmatprep.subr.bf16.mxu0 %v688_v10  ;;  %659 = vmatprep.subr.bf16.mxu1 %v688_v10  ;;  %v299_v39 = vadd.f32 %v291_v24, %v279_v31  ;;  %v301_v41 = vadd.f32 %v291_v24, %v281_v34  ;;  %v294_v42 = vadd.f32 %v287_v23, %v274_v35  ;;  %v704_v10 = vmov (!%p623_p4), 0.0  }
  0x15   : > { %v296_v43 = vadd.f32 %v287_v23, %v276_v36  ;;  %v280_v44 = vmul.f32 %v267_v18, %v260_v32  ;;  %v303_v46 = vmax.f32 %v295_v37, 0.0  ;;  %v305_v47 = vmax.f32 %v297_v38, 0.0  ;;  %499 = vst [vmem:[%s842_s5] sm:$0x1] (!%p623_p4), %v704_v10  ;;  %500 = vst [vmem:[%s843_s6] sm:$0x1] (!%p623_p4), %v704_v10 }
  0x16   : > { %v307_v48 = vmax.f32 %v299_v39, 0.0  ;;  %v298_v49 = vadd.f32 %v287_v23, %v278_v40  ;;  %v309_v51 = vmax.f32 %v301_v41, 0.0  ;;  %v302_v54 = vmax.f32 %v294_v42, 0.0 }
  0x17   : > { %636 = vmatpush3.bf16.msra.mxu0 %v689_v13  ;;  %667 = vmatpush3.bf16.msra.mxu1 %v689_v13  ;;  %v300_v52 = vadd.f32 %v287_v23, %v280_v44  ;;  %v311_v53 = vpack.c.bf16 %v305_v47, %v303_v46  ;;  %v304_v56 = vmax.f32 %v296_v43, 0.0 }
  0x18   : > { %637 = vmatprep.subr.bf16.mxu0 %v690_v14  ;;  %660 = vmatprep.subr.bf16.mxu1 %v690_v14  ;;  %v313_v55 = vpack.c.bf16 %v309_v51, %v307_v48  ;;  %v306_v57 = vmax.f32 %v298_v49, 0.0 }
  0x19   : > { %v308_v58 = vmax.f32 %v300_v52, 0.0  ;;  %474 = vmatprep.mubr.bf16.mxu0 %v311_v53  ;;  %v310_v60 = vpack.c.bf16 %v304_v56, %v302_v54 }
  0x1a   : > { %482 = vmatprep.mubr.bf16.mxu1 %v313_v55 }
  0x1b   : > { %638 = vmatpush3.bf16.msra.mxu0 %v691_v28  ;;  %668 = vmatpush3.bf16.msra.mxu1 %v691_v28  ;;  %v312_v61 = vpack.c.bf16 %v308_v58, %v306_v57 }
  0x1c   : > { %639 = vmatprep.subr.bf16.mxu0 %v692_v33  ;;  %661 = vmatprep.subr.bf16.mxu1 %v692_v33 }
  0x1f   : > { %640 = vmatpush3.bf16.msra.mxu0 %v693_v45  ;;  %669 = vmatpush3.bf16.msra.mxu1 %v693_v45 }
  0x20   : > { %641 = vmatprep.subr.bf16.mxu0 %v694_v50  ;;  %662 = vmatprep.subr.bf16.mxu1 %v694_v50 }
  0x23   : > { %642 = vmatpush3.bf16.msra.mxu0 %v695_v59  ;;  %670 = vmatpush3.bf16.msra.mxu1 %v695_v59 }
  0x26   : > { %475 = vmatmul.mubr.bf16.vlgmr.msra.gmra.mrb[0].mxu0 %v310_v60  ;;  %483 = vmatmul.mubr.bf16.vlgmr.msra.gmra.mrb[0].mxu1 %v312_v61 }
  0xf9   : > { %v643_v62 = vpop.f32.mrb[0].mxu0  ;;  %v649_v63 = vpop.f32.mrb[0].mxu1  ;;  %498 = sbr.rel (%p623_p4) target bundleno = 256 (0x100), region = 40 }
  0xfa   : > { %v644_v0 = vpop.f32.mrb[1].mxu0  ;;  %v650_v1 = vpop.f32.mrb[1].mxu1 }
  0xfb   : > { %v645_v2 = vadd.f32 %v644_v0, %v643_v62  ;;  %v651_v3 = vadd.f32 %v650_v1, %v649_v63  ;;  %v646_v4 = vpop.f32.mrb[2].mxu0  ;;  %v652_v5 = vpop.f32.mrb[2].mxu1 }
  0xfc   : > { %v647_v6 = vpop.f32.mrb[3].mxu0  ;;  %v653_v7 = vpop.f32.mrb[3].mxu1 }
  0xfd   : > { %491 = vst [vmem:[%s251_s24] sm:$0xff] %v645_v2  ;;  %v648_v8 = vadd.f32 %v647_v6, %v646_v4  ;;  %v654_v9 = vadd.f32 %v653_v7, %v652_v5  ;;  %493 = vst [vmem:[%s251_s24 + $0x10] sm:$0xff] %v651_v3 }
  0xff   : > { %492 = vst [vmem:[%s251_s24 + $0x8] sm:$0xff] %v648_v8  ;;  %494 = vst [vmem:[%s251_s24 + $0x18] sm:$0xff] %v654_v9 }
 0x100 PF: > { %v502_v11 = vadd.f32 %v648_v8, %v645_v2  ;;  %v514_v12 = vmul.f32 %v645_v2, %v645_v2  ;;  %v515_v13 = vmul.f32 %v648_v8, %v648_v8  ;;  %v516_v14 = vmul.f32 %v651_v3, %v651_v3  ;;  %v501_v30 = vld [vmem:[%s842_s5] sm:$0x1] }
 0x101   : > { %v517_v16 = vmul.f32 %v654_v9, %v654_v9  ;;  %v513_v33 = vld [vmem:[%s843_s6] sm:$0x1] }
 0x102   : > { %v503_v15 = vadd.f32 %v651_v3, %v502_v11  ;;  %v518_v17 = vadd.f32 %v515_v13, %v514_v12 }
 0x104   : > { %v504_v18 = vadd.f32 %v654_v9, %v503_v15  ;;  %v519_v19 = vadd.f32 %v518_v17, %v516_v14 }
 0x106   : > { %v505_v20 = vrot.slane %v504_v18, 4  ;;  %v520_v21 = vadd.f32 %v519_v19, %v517_v16 }
 0x108   : > { %v506_v22 = vadd.f32 %v505_v20, %v504_v18  ;;  %v521_v23 = vrot.slane %v520_v21, 4 }
 0x10a   : > { %v507_v24 = vrot.slane %v506_v22, 2  ;;  %v522_v25 = vadd.f32 %v521_v23, %v520_v21 }
 0x10c   : > { %v508_v26 = vadd.f32 %v507_v24, %v506_v22  ;;  %v523_v27 = vrot.slane %v522_v25, 2 }
 0x10e   : > { %v509_v28 = vrot.slane %v508_v26, 1  ;;  %v524_v29 = vadd.f32 %v523_v27, %v522_v25 }
 0x110   : > { %v510_v31 = vadd.f32 %v509_v28, %v508_v26  ;;  %v525_v32 = vrot.slane %v524_v29, 1 }
 0x112   : > { %v511_v34 = vadd.f32 %v510_v31, %v501_v30  ;;  %v526_v35 = vadd.f32 %v525_v32, %v524_v29 }
 0x114   : > { %512 = vst [vmem:[%s842_s5] sm:$0x1] %v511_v34  ;;  %v527_v36 = vadd.f32 %v526_v35, %v513_v33 }
 0x116   : > { %528 = vst [vmem:[%s843_s6] sm:$0x1] %v527_v36 }
 0x117 PF: > { %s17_s21 = sadd.s32 1, %s702_s21  }
 0x118   : > { %p14_p5 = scmp.ge.s32.totalorder %s17_s21, 4  }
 0x11a   :  { %16 = sbr.rel (!%p14_p5) target bundleno = 1 (0x1), region = 86 }

</bundles_post_ra>
